<compile_context>
chip_gen: v7x
topology: tpu7x:2x2x1
jax: 0.10.0
libtpu: 0.0.40
codegen_flags: <defaults>
</compile_context>

<pallas_src>
import math

import numpy as np
import jax
import jax.numpy as jnp
from jax.experimental import pallas as pl
from jax.experimental.pallas import tpu as pltpu


def _round_up(x, m):
    return -(-x // m) * m


def _pe_kernel(loc_ref, sel_ref, phase_ref, out_ref):
    # loc_ref   : (bn, p*nd)   packed coordinates (p points per row)
    # sel_ref   : (p*nd, p*D)  constant block-diagonal frequency matrix
    # phase_ref : (1, p*D)     constant phase row: 0 on sin columns, pi/2 on cos columns
    # out_ref   : (bn, p*D)    lane-dense output (p*D is a multiple of 128)
    arg = jnp.dot(loc_ref[...], sel_ref[...], preferred_element_type=jnp.float32)
    out_ref[...] = jnp.sin(arg + phase_ref[...])


def _build_constants(num_terms, n_dims, p):
    """Trace-time numpy constants: frequency-selection matrix and phase row."""
    D = 2 * num_terms * n_dims
    Dp = p * D

    jj = np.arange(Dp)                                  # packed output column
    j = jj % D                                          # within-copy output column
    c_out = jj // D                                     # copy index of output column
    freq = (2.0 ** (j // (2 * n_dims))).astype(np.float32) * np.float32(np.pi)
    # cos(x) == sin(x + pi/2): 0 phase on sin columns, pi/2 on cos columns.
    phase = np.where((j % (2 * n_dims)) < n_dims, 0.0, np.pi / 2.0).astype(np.float32)

    kk = np.arange(p * n_dims)                          # packed input column
    c_in = kk // n_dims                                 # copy index of input column
    d_in = kk % n_dims                                  # coordinate index
    sel = np.where(
        (c_in[:, None] == c_out[None, :]) & (d_in[:, None] == (j % n_dims)[None, :]),
        freq[None, :],
        0.0,
    ).astype(np.float32)                                # (p*nd, Dp)
    return sel, phase.reshape(1, Dp)


def positional_encoding(locations, num_terms, n_dims, block_rows=1024):
    """Pallas TPU positional encoding.

    locations: float array [..., n_dims]
    returns:   float32 array [..., 2 * num_terms * n_dims]
    """
    assert locations.shape[-1] == n_dims
    lead_shape = locations.shape[:-1]
    D = 2 * num_terms * n_dims

    # Packing factor: p consecutive points per packed row -> lane-dense last dim.
    p = 128 // math.gcd(128, D)
    Dp = p * D
    Kp = p * n_dims

    loc2d = locations.reshape(-1, n_dims).astype(jnp.float32)
    N = loc2d.shape[0]

    # --- choose packed-row tile -------------------------------------------------
    Np0 = -(-N // p)  # packed rows needed
    # VMEM cap: keep one output tile <= ~4 MiB (double-buffered it stays small).
    vmem_cap = max(8, ((4 * 1024 * 1024) // (Dp * 4)) // 8 * 8)
    bn = min(block_rows, _round_up(Np0, 8), vmem_cap)
    bn = max(8, (bn // 8) * 8)
    # Keep grid length >= 2 when there is enough work (v7x megacore sharding).
    if Np0 > 8 and _round_up(Np0, bn) // bn < 2:
        bn = max(8, _round_up(-(-Np0 // 2), 8))
    Np_pad = _round_up(Np0, bn)
    N_pad = Np_pad * p

    # --- pack the input (free row-major reshape when no padding is needed) ------
    if N_pad != N:
        loc2d = jnp.pad(loc2d, ((0, N_pad - N), (0, 0)))
    loc_packed = loc2d.reshape(Np_pad, Kp)

    sel_np, phase_np = _build_constants(num_terms, n_dims, p)
    sel = jnp.asarray(sel_np)        # (Kp, Dp) — tiny constant
    phase = jnp.asarray(phase_np)    # (1, Dp)  — tiny constant

    # --- pallas call -------------------------------------------------------------
    out = pl.pallas_call(
        _pe_kernel,
        out_shape=jax.ShapeDtypeStruct((Np_pad, Dp), jnp.float32),
        grid=(Np_pad // bn,),
        in_specs=[
            pl.BlockSpec((bn, Kp), lambda i: (i, 0)),
            pl.BlockSpec((Kp, Dp), lambda i: (0, 0)),
            pl.BlockSpec((1, Dp), lambda i: (0, 0)),
        ],
        out_specs=pl.BlockSpec((bn, Dp), lambda i: (i, 0)),
        compiler_params=pltpu.CompilerParams(dimension_semantics=("parallel",)),
    )(loc_packed, sel, phase)

    out = out.reshape(N_pad, D)   # free view: row-major (Np_pad, p*D) == (N_pad, D)
    if N_pad != N:
        out = out[:N]
    return out.reshape(*lead_shape, D)


def _reference(locations, num_terms, n_dims):
    """Pure-JAX reference mirroring the PyTorch forward (exact cos, no phase trick)."""
    D = 2 * num_terms * n_dims
    j = jnp.arange(D)
    lterms = (2.0 ** (j // (2 * n_dims)).astype(jnp.float32)) * math.pi
    rep = jnp.tile(locations, (1,) * (locations.ndim - 1) + (2 * num_terms,))
    t = rep * lterms
    sin_mask = (j % (2 * n_dims)) < n_dims
    return jnp.where(sin_mask, jnp.sin(t), jnp.cos(t))


if __name__ == "__main__":
    key = jax.random.PRNGKey(0)
    # opt: num_positional_encoding_terms = 8, n_dims = 2
    L, n_dims = 8, 2
    batch, points = 2, 128
    locations = jax.random.uniform(
        key, (batch, points, n_dims), dtype=jnp.float32, minval=-1.0, maxval=1.0
    )

    pe_fn = jax.jit(lambda x: positional_encoding(x, L, n_dims))
    out = jax.block_until_ready(pe_fn(locations))

    ref = _reference(locations, L, n_dims)
    assert out.shape == (batch, points, 2 * L * n_dims), out.shape
    # Note: cos is computed as sin(x + pi/2); difference vs exact cos is ~1 ulp,
    # well within this tolerance.
    assert jnp.allclose(out, ref, atol=1e-5, rtol=1e-5), "mismatch vs reference"

    print("KERNEL_OK")
</pallas_src>

<mosaic_0001>
module attributes {stable_mosaic.version = 11 : i64} {
  func.func @_pe_kernel(%arg0: i32, %arg1: memref<32x8xf32, #tpu.memory_space<vmem>>, %arg2: memref<8x128xf32, #tpu.memory_space<vmem>>, %arg3: memref<1x128xf32, #tpu.memory_space<vmem>>, %arg4: memref<32x128xf32, #tpu.memory_space<vmem>>) attributes {dimension_semantics = [#tpu.dimension_semantics<parallel>], iteration_bounds = array<i64: 2>, scalar_prefetch = 0 : i64, scratch_operands = 0 : i64, tpu.core_type = #tpu.core_type<tc>, window_params = [{transform_indices = @transform_0, window_bounds = array<i64: 32, 8>}, {pipeline_mode = #tpu.pipeline_mode<synchronous>, transform_indices = @transform_1, window_bounds = array<i64: 8, 128>}, {pipeline_mode = #tpu.pipeline_mode<synchronous>, transform_indices = @transform_2, window_bounds = array<i64: 1, 128>}, {transform_indices = @transform_3, window_bounds = array<i64: 32, 128>}]} {
    %c0 = arith.constant 0 : index
    %c0_0 = arith.constant 0 : index
    %0 = vector.load %arg1[%c0, %c0_0] : memref<32x8xf32, #tpu.memory_space<vmem>>, vector<32x8xf32>
    %c0_1 = arith.constant 0 : index
    %c0_2 = arith.constant 0 : index
    %1 = vector.load %arg2[%c0_1, %c0_2] : memref<8x128xf32, #tpu.memory_space<vmem>>, vector<8x128xf32>
    %cst = arith.constant dense<0.000000e+00> : vector<32x128xf32>
    %2 = tpu.matmul %0, %1, %cst {dimension_numbers = #tpu.dot_dimension_numbers<[1], [0], [0], [1], [0, 0, 1, 1], [], []>} : vector<32x8xf32>, vector<8x128xf32>, vector<32x128xf32> -> vector<32x128xf32>
    %c0_3 = arith.constant 0 : index
    %c0_4 = arith.constant 0 : index
    %3 = vector.load %arg3[%c0_3, %c0_4] : memref<1x128xf32, #tpu.memory_space<vmem>>, vector<1x128xf32>
    %4 = vector.broadcast %3 : vector<1x128xf32> to vector<32x128xf32>
    %5 = arith.addf %2, %4 : vector<32x128xf32>
    %6 = math.sin %5 : vector<32x128xf32>
    %c0_5 = arith.constant 0 : index
    %c0_6 = arith.constant 0 : index
    %7 = vector.load %arg4[%c0_5, %c0_6] : memref<32x128xf32, #tpu.memory_space<vmem>>, vector<32x128xf32>
    tpu.vector_store %arg4[%c0_5, %c0_6], %6 {strides = array<i32>} : memref<32x128xf32, #tpu.memory_space<vmem>>, vector<32x128xf32>,
    return
  }
  func.func @transform_0(%arg0: i32) -> (i32, i32) {
    %c0_i32 = arith.constant 0 : i32
    %c0_i32_0 = arith.constant 0 : i32
    return %arg0, %c0_i32 : i32, i32
  }
  func.func @transform_1(%arg0: i32) -> (i32, i32) {
    %c0_i32 = arith.constant 0 : i32
    %c0_i32_0 = arith.constant 0 : i32
    %c0_i32_1 = arith.constant 0 : i32
    return %c0_i32, %c0_i32_0 : i32, i32
  }
  func.func @transform_2(%arg0: i32) -> (i32, i32) {
    %c0_i32 = arith.constant 0 : i32
    %c0_i32_0 = arith.constant 0 : i32
    %c0_i32_1 = arith.constant 0 : i32
    return %c0_i32, %c0_i32_0 : i32, i32
  }
  func.func @transform_3(%arg0: i32) -> (i32, i32) {
    %c0_i32 = arith.constant 0 : i32
    %c0_i32_0 = arith.constant 0 : i32
    return %arg0, %c0_i32 : i32, i32
  }
}

</mosaic_0001>

<bundles_post_ra>
// kernel: _lambda_.1
= control target key start
LH: loop header
LB: loop body
LE: loop exit
PB: predicated region body
PF: predicated region fallthrough
CT: control target
= control target key end

     0   :  { %s887_s12 = smov 0   ;;  %s1196_s0 = inlined_call_operand.vmem [shape: f32[64,8], index: 0, kind: input, shape index: {}]   ;;  %s1197_s1 = inlined_call_operand.vmem [shape: f32[8,128], index: 1, kind: input, shape index: {}]   ;;  %s1198_s2 = inlined_call_operand.vmem [shape: f32[1,128], index: 2, kind: input, shape index: {}]   ;;  %s1199_s3 = inlined_call_operand.vmem [shape: f32[64,128], index: 3, kind: output, shape index: {}]  }
   0x1 LB: > { %s760_s13 = sadd.s32 4294967295, %s859_s12   ;;  %p764_p0 = scmp.ge.s32.totalorder %s859_s12, 1  ;;  %s859_s12 = sphi %s887_s12, %s13_s12  }
   0x2   : > { %p138_p1 = scmp.lt.s32.totalorder %s859_s12, 3 }
   0x4   : > { %p139_p2 = pnand %p764_p0, %p138_p1 }
   0x5   : > { %v178_v0 = vld [vmem:[%s1197_s1] sm:$0xff] (!%p139_p2)  ;;  %s765_s16 = sshll.u32 (!%p139_p2), %s760_s13, 2  ;;  %vm186_vm0 = vcmask (!%p139_p2), 64512   ;;  %v861_v39 = vmov (!%p139_p2), 683565275  }
   0x6   : > { %142 = sbr.rel (%p139_p2) target bundleno = 362 (0x16a), region = 32  ;;  %797 = vmatprep.subr.mxu0 (!%p139_p2), %v178_v0  ;;  %805 = vmatprep.subr.mxu1 (!%p139_p2), %v178_v0  ;;  %p163_p3 = scmp.lt.s32.totalorder (!%p139_p2), %s765_s16, 7  ;;  %v909_v5 = vld [vmem:[%s1198_s2] ss:$0 sm:$0xff] (!%p139_p2)  ;;  %v862_v43 = vmov (!%p139_p2), 2475754826  }
   0x7   : > { %798 = vmatpush3.msra.mxu0 (!%p139_p2), %v178_v0  ;;  %806 = vmatpush3.msra.mxu1 (!%p139_p2), %v178_v0  ;;  %v863_v45 = vmov (!%p139_p2), 2131351028   ;;  %v864_v47 = vmov (!%p139_p2), 2102212464   ;;  %v865_v49 = vmov (!%p139_p2), 920167782  }
   0x8   : > { %v866_v56 = vmov (!%p139_p2), 1326507024  }
   0xd   : > { %s1205_s16 = smov (!%p163_p3, %s765_s16), 7 }
   0xe   : > { %s766_s17 = sshll.u32 %s1205_s16, 3 }
   0xf   : > { %s166_s20 = scalar_lea.vmem %s1196_s0, %s766_s17  ;;  %s1171_s25 = scalar_lea.vmem %s1199_s3, %s766_s17 }
  0x10   : > { %v174_v1 = vld [vmem:[%s166_s20] sm:$0xff]  ;;  %v176_v2 = vld [vmem:[%s166_s20 + $0x10] sm:$0xff]  ;;  %v175_v3 = vld [vmem:[%s166_s20 + $0x8] sm:$0xff] }
  0x11   : > { %799 = vmatprep.mubr.msk.f32.mxu0 %vm186_vm0, %v174_v1  ;;  %802 = vmatprep.mubr.msk.f32.mxu1 %vm186_vm0, %v176_v2  ;;  %v177_v4 = vld [vmem:[%s166_s20 + $0x18] sm:$0xff] }
  0x12   : > { %800 = vmatmul.mubr.msk.f32.vlgmr.msra.gmra.mrb[0].mxu0 %vm186_vm0, %v175_v3  ;;  %803 = vmatmul.mubr.msk.f32.vlgmr.msra.gmra.mrb[0].mxu1 %vm186_vm0, %v177_v4 }
  0xe5   : > { %v801_v6 = vpop.f32.mrb[0].mxu0  ;;  %v804_v7 = vpop.f32.mrb[0].mxu1 }
  0xe6   : > { %v912_v8 = vadd.f32 %v801_v6, %v909_v5  ;;  %v915_v9 = vadd.f32 %v804_v7, %v909_v5  ;;  %v265_v10 = vpop.f32.mrb[1].mxu0  ;;  %v917_v11 = vpop.f32.mrb[1].mxu1 }
  0xe7   : > { %v920_v12 = vadd.f32 %v909_v5, %v265_v10 }
  0xe8   : > { %v388_v13 = vand.u32 2147483647, %v912_v8  ;;  %v391_v14 = vand.u32 2139095040, %v912_v8  ;;  %v596_v15 = vand.u32 2147483647, %v915_v9  ;;  %v599_v16 = vand.u32 2139095040, %v915_v9 }
  0xe9   : > { %v287_v21 = vand.u32 2139095040, %v920_v12  ;;  %v284_v36 = vand.u32 2147483647, %v920_v12 }
  0xea   : > { %v392_v17 = vshrl.u32 %v391_v14, 23  ;;  %v395_v18 = vand.u32 8388607, %v388_v13  ;;  %v600_v19 = vshrl.u32 %v599_v16, 23  ;;  %v603_v20 = vand.u32 8388607, %v596_v15 }
  0xeb   : > { %v288_v24 = vshrl.u32 %v287_v21, 23 }
  0xec   : > { %v778_v22 = vadd.s32 4294967169, %v392_v17  ;;  %v786_v23 = vadd.s32 4294967169, %v600_v19  ;;  %v396_v26 = vor.u32 8388608, %v395_v18  ;;  %v604_v27 = vor.u32 8388608, %v603_v20 }
  0xed   : > { %v774_v29 = vadd.s32 4294967169, %v288_v24 }
  0xee   : > { %v398_v25 = vadd.s32 1, %v778_v22  ;;  %v606_v28 = vadd.s32 1, %v786_v23  ;;  %v931_v34 = vshll.u32 %v396_v26, 8  ;;  %v933_v35 = vshll.u32 %v604_v27, 8 }
  0xef   : > { %v936_v37 = vadd.s32 1, %v774_v29 }
  0xf0   : > { %vm399_vm1 = vcmp.gt.s32.totalorder %v398_v25, 0  ;;  %vm607_vm2 = vcmp.gt.s32.totalorder %v606_v28, 0 }
  0xf1   : > { %v400_v30 = vsel %vm399_vm1, %v398_v25, 0  ;;  %v608_v33 = vsel %vm607_vm2, %v606_v28, 0  ;;  %vm295_vm6 = vcmp.gt.s32.totalorder %v936_v37, 0 }
  0xf2   : > { %v401_v31 = vshrl.u32 %v400_v30, 5  ;;  %v402_v32 = vand.u32 31, %v400_v30  ;;  %v939_v41 = vshrl.u32 %v608_v33, 5  ;;  %v610_v42 = vand.u32 31, %v608_v33 }
  0xf4   : > { %v403_v38 = vsub.s32 32, %v402_v32  ;;  %v405_v40 = vshll.u32 %v861_v39, %v402_v32  ;;  %v408_v44 = vshll.u32 %v862_v43, %v402_v32  ;;  %v411_v46 = vshll.u32 %v863_v45, %v402_v32 }
  0xf5   : > { %v414_v48 = vshll.u32 %v864_v47, %v402_v32  ;;  %v417_v50 = vshll.u32 %v865_v49, %v402_v32  ;;  %vm420_vm3 = vcmp.lt.s32.totalorder %v401_v31, 1  ;;  %vm422_vm4 = vcmp.lt.s32.totalorder %v401_v31, 3 }
  0xf6   : > { %v406_v51 = vshrl.u32 %v862_v43, %v403_v38  ;;  %v409_v52 = vshrl.u32 %v863_v45, %v403_v38  ;;  %v412_v53 = vshrl.u32 %v864_v47, %v403_v38  ;;  %v404_v54 = vshrl.u32 %v861_v39, %v403_v38 }
  0xf7   : > { %v415_v55 = vshrl.u32 %v865_v49, %v403_v38  ;;  %v418_v57 = vshrl.u32 %v866_v56, %v403_v38  ;;  %v611_v61 = vsub.s32 32, %v610_v42  ;;  %vm423_vm5 = vcmp.lt.s32.totalorder %v401_v31, 4 }
  0xf8   : > { %v407_v58 = vor.u32 %v406_v51, %v405_v40  ;;  %v410_v59 = vor.u32 %v409_v52, %v408_v44  ;;  %v413_v60 = vor.u32 %v412_v53, %v411_v46  ;;  %v613_v0 = vshll.u32 %v861_v39, %v610_v42 }
  0xf9   : > { %v416_v62 = vor.u32 %v415_v55, %v414_v48  ;;  %v419_v63 = vor.u32 %v418_v57, %v417_v50  ;;  %v616_v14 = vshll.u32 %v862_v43, %v610_v42  ;;  %vm421_vm7 = vcmp.lt.s32.totalorder %v401_v31, 2 }
  0xfa   : > { %v424_v1 = vsel %vm420_vm3, %v404_v54, %v407_v58  ;;  %v425_v2 = vsel %vm423_vm5, %v413_v60, 2102212464  ;;  %v428_v3 = vsel %vm420_vm3, %v407_v58, %v410_v59  ;;  %v432_v4 = vsel %vm420_vm3, %v410_v59, %v413_v60 }
  0xfb   : > { %v426_v6 = vsel %vm422_vm4, %v410_v59, %v425_v2  ;;  %v429_v7 = vsel %vm423_vm5, %v416_v62, 920167782  ;;  %v433_v10 = vsel %vm423_vm5, %v419_v63, 1326507024  ;;  %v614_v18 = vshrl.u32 %v862_v43, %v611_v61 }
  0xfc   : > { %v430_v16 = vsel %vm422_vm4, %v413_v60, %v429_v7  ;;  %v434_v17 = vsel %vm422_vm4, %v416_v62, %v433_v10  ;;  %v427_v19 = vsel %vm421_vm7, %v424_v1, %v426_v6  ;;  %v617_v22 = vshrl.u32 %v863_v45, %v611_v61 }
  0xfd   : > { %v431_v20 = vsel %vm421_vm7, %v428_v3, %v430_v16  ;;  %v435_v21 = vsel %vm421_vm7, %v432_v4, %v434_v17  ;;  %v615_v27 = vor.u32 %v614_v18, %v613_v0  ;;  %v619_v29 = vshll.u32 %v863_v45, %v610_v42 }
  0xfe   : > { %v963_v23 = vmul.u32.u64.low %v931_v34, %v435_v21  ;;  %v964_v24 = vmul.u32.u64.high %v931_v34, %v435_v21, %v963_v23  ;;  %v967_v25 = vmul.u32.u64.low %v931_v34, %v431_v20  ;;  %v968_v26 = vmul.u32.u64.high %v931_v34, %v431_v20, %v967_v25 }
  0xff   : > { %v618_v28 = vor.u32 %v617_v22, %v616_v14  ;;  %v620_v30 = vshrl.u32 %v864_v47, %v611_v61  ;;  %v622_v31 = vshll.u32 %v864_v47, %v610_v42  ;;  %v623_v32 = vshrl.u32 %v865_v49, %v611_v61 }
 0x100   : > { %v625_v33 = vshll.u32 %v865_v49, %v610_v42  ;;  %v626_v38 = vshrl.u32 %v866_v56, %v611_v61  ;;  %v443_v40 = vmul.u32 %v931_v34, %v427_v19  ;;  %v612_v44 = vshrl.u32 %v861_v39, %v611_v61 }
 0x101   : > { %v621_v46 = vor.u32 %v620_v30, %v619_v29  ;;  %vm628_vm8 = vcmp.lt.s32.totalorder %v939_v41, 1  ;;  %vm445_vm9 = vc.u32 %v964_v24, %v967_v25  ;;  %v446_v48 = vadd.s32 1, %v968_v26 }
 0x102   : > { %v624_v50 = vor.u32 %v623_v32, %v622_v31  ;;  %vm629_vm10 = vcmp.lt.s32.totalorder %v939_v41, 2  ;;  %v627_v51 = vor.u32 %v626_v38, %v625_v33  ;;  %vm630_vm11 = vcmp.lt.s32.totalorder %v939_v41, 3 }
 0x103   : > { %vm631_vm12 = vcmp.lt.s32.totalorder %v939_v41, 4  ;;  %v636_v42 = vsel %vm628_vm8, %v615_v27, %v618_v28  ;;  %v447_v34 = vsel %vm445_vm9, %v446_v48, %v968_v26  ;;  %v640_v54 = vsel %vm628_vm8, %v618_v28, %v621_v46 }
 0x104   : > { %v633_v52 = vsel %vm631_vm12, %v621_v46, 2102212464  ;;  %v637_v53 = vsel %vm631_vm12, %v624_v50, 920167782  ;;  %v448_v55 = vadd.s32 %v447_v34, %v443_v40  ;;  %v632_v57 = vsel %vm628_vm8, %v612_v44, %v615_v27 }
 0x105   : > { %v638_v58 = vsel %vm630_vm11, %v621_v46, %v637_v53  ;;  %v641_v59 = vsel %vm631_vm12, %v627_v51, 1326507024  ;;  %v634_v60 = vsel %vm630_vm11, %v618_v28, %v633_v52  ;;  %v296_v63 = vsel %vm295_vm6, %v936_v37, 0 }
 0x106   : > { %v639_v61 = vsel %vm629_vm10, %v636_v42, %v638_v58  ;;  %v642_v62 = vsel %vm630_vm11, %v624_v50, %v641_v59  ;;  %v449_v0 = vadd.s32 536870912, %v448_v55  ;;  %v1005_v7 = vadd.f32 %v909_v5, %v917_v11 }
 0x107   : > { %v643_v1 = vsel %vm629_vm10, %v640_v54, %v642_v62  ;;  %v995_v2 = vmul.u32.u64.low %v933_v35, %v639_v61  ;;  %v996_v3 = vmul.u32.u64.high %v933_v35, %v639_v61, %v995_v2  ;;  %v635_v37 = vsel %vm629_vm10, %v632_v57, %v634_v60 }
 0x108   : > { %v1000_v4 = vmul.u32.u64.low %v933_v35, %v643_v1  ;;  %v1001_v6 = vmul.u32.u64.high %v933_v35, %v643_v1, %v1000_v4  ;;  %v1007_v10 = vshrl.u32 %v449_v0, 30  ;;  %v298_v14 = vand.u32 31, %v296_v63 }
 0x109   : > { %v654_v17 = vadd.s32 1, %v996_v3  ;;  %v291_v18 = vand.u32 8388607, %v284_v36  ;;  %v651_v20 = vmul.u32 %v933_v35, %v635_v37  ;;  %v495_v5 = vand.u32 2139095040, %v1005_v7 }
 0x10a   : > { %v451_v16 = vshll.u32 %v1007_v10, 30  ;;  %v299_v19 = vsub.s32 32, %v298_v14  ;;  %vm653_vm13 = vc.u32 %v1001_v6, %v995_v2  ;;  %v297_v30 = vshrl.u32 %v296_v63, 5 }
 0x10b   : > { %v655_v41 = vsel %vm653_vm13, %v654_v17, %v996_v3  ;;  %v292_v26 = vor.u32 8388608, %v291_v18  ;;  %v301_v35 = vshll.u32 %v861_v39, %v298_v14  ;;  %v496_v31 = vshrl.u32 %v495_v5, 23 }
 0x10c   : > { %v452_v11 = vsub.s32 %v448_v55, %v451_v16  ;;  %v656_v21 = vadd.s32 %v655_v41, %v651_v20  ;;  %v302_v22 = vshrl.u32 %v862_v43, %v299_v19  ;;  %v305_v27 = vshrl.u32 %v863_v45, %v299_v19 }
 0x10d   : > { %v308_v28 = vshrl.u32 %v864_v47, %v299_v19  ;;  %v304_v33 = vshll.u32 %v862_v43, %v298_v14  ;;  %v307_v38 = vshll.u32 %v863_v45, %v298_v14  ;;  %v311_v40 = vshrl.u32 %v865_v49, %v299_v19 }
 0x10e   : > { %v454_v23 = vsub.s32 0, %v452_v11  ;;  %v657_v29 = vadd.s32 536870912, %v656_v21  ;;  %v303_v46 = vor.u32 %v302_v22, %v301_v35  ;;  %v310_v48 = vshll.u32 %v864_v47, %v298_v14 }
 0x10f   : > { %v314_v50 = vshrl.u32 %v866_v56, %v299_v19  ;;  %v306_v42 = vor.u32 %v305_v27, %v304_v33  ;;  %v309_v34 = vor.u32 %v308_v28, %v307_v38  ;;  %v313_v52 = vshll.u32 %v865_v49, %v298_v14 }
 0x110   : > { %v779_v32 = vmin.u32 %v454_v23, %v452_v11  ;;  %v1027_v44 = vshrl.u32 %v657_v29, 30  ;;  %v312_v53 = vor.u32 %v311_v40, %v310_v48  ;;  %v332_v54 = vshll.u32 %v292_v26, 8 }
 0x111   : > { %v444_v55 = vadd.s32 %v967_v25, %v964_v24  ;;  %v315_v58 = vor.u32 %v314_v50, %v313_v52  ;;  %vm319_vm14 = vcmp.lt.s32.totalorder %v297_v30, 4  ;;  %vm316_vm15 = vcmp.lt.s32.totalorder %v297_v30, 1 }
 0x112   : > { %v456_v51 = vclz %v779_v32  ;;  %v659_v59 = vshll.u32 %v1027_v44, 30  ;;  %vm318_vm0 = vcmp.lt.s32.totalorder %v297_v30, 3  ;;  %v325_v60 = vsel %vm319_vm14, %v312_v53, 920167782 }
 0x113   : > { %v324_v61 = vsel %vm316_vm15, %v303_v46, %v306_v42  ;;  %v326_v62 = vsel %vm318_vm0, %v309_v34, %v325_v60  ;;  %v782_v63 = vadd.s32 4294967169, %v496_v31  ;;  %v300_v1 = vshrl.u32 %v861_v39, %v299_v19 }
 0x114   : > { %v780_v57 = vadd.s32 4294967294, %v456_v51  ;;  %vm317_vm2 = vcmp.lt.s32.totalorder %v297_v30, 2  ;;  %v328_v24 = vsel %vm316_vm15, %v306_v42, %v309_v34  ;;  %v321_v4 = vsel %vm319_vm14, %v309_v34, 2102212464 }
 0x115   : > { %v329_v37 = vsel %vm319_vm14, %v315_v58, 1326507024  ;;  %v1042_v16 = vsub.s32 %v656_v21, %v659_v59  ;;  %v327_v17 = vsel %vm317_vm2, %v324_v61, %v326_v62  ;;  %v502_v41 = vadd.s32 1, %v782_v63 }
 0x116   : > { %vm781_vm1 = vcmp.lt.s32.totalorder %v780_v57, 0  ;;  %v330_v18 = vsel %vm318_vm0, %v312_v53, %v329_v37  ;;  %v320_v22 = vsel %vm316_vm15, %v300_v1, %v303_v46  ;;  %v322_v23 = vsel %vm318_vm0, %v306_v42, %v321_v4 }
 0x117   : > { %v459_v0 = vsel %vm781_vm1, 0, %v780_v57  ;;  %v331_v19 = vsel %vm317_vm2, %v328_v24, %v330_v18  ;;  %v1053_v21 = vmul.u32.u64.low %v332_v54, %v327_v17  ;;  %v1054_v35 = vmul.u32.u64.high %v332_v54, %v327_v17, %v1053_v21 }
 0x118   : > { %v460_v25 = vsub.s32 32, %v459_v0  ;;  %v464_v3 = vsub.s32 4294967266, %v459_v0  ;;  %v461_v14 = vshll.u32 %v452_v11, %v459_v0  ;;  %v662_v11 = vsub.s32 0, %v1042_v16 }
 0x119   : > { %v1049_v28 = vmul.u32.u64.low %v332_v54, %v331_v19  ;;  %v1050_v29 = vmul.u32.u64.high %v332_v54, %v331_v19, %v1049_v28  ;;  %vm503_vm3 = vcmp.gt.s32.totalorder %v502_v41, 0  ;;  %v474_v32 = vsub.s32 4, %v1007_v10 }
 0x11a   : > { %v462_v20 = vshrl.u32 %v444_v55, %v460_v25  ;;  %v465_v5 = vadd.s32 127, %v464_v3  ;;  %v504_v33 = vsel %vm503_vm3, %v502_v41, 0  ;;  %v323_v38 = vsel %vm317_vm2, %v320_v22, %v322_v23 }
 0x11b   : > { %v506_v40 = vand.u32 31, %v504_v33  ;;  %vm341_vm4 = vc.u32 %v1050_v29, %v1053_v21  ;;  %v492_v50 = vand.u32 2147483647, %v1005_v7  ;;  %vm390_vm5 = vcmp.lt.s32.totalorder %v912_v8, 0 }
 0x11c   : > { %v463_v26 = vor.u32 %v462_v20, %v461_v14  ;;  %v466_v27 = vshll.u32 %v465_v5, 23  ;;  %v787_v51 = vmin.u32 %v662_v11, %v1042_v16  ;;  %v342_v42 = vadd.s32 1, %v1054_v35 }
 0x11d   : > { %v475_v30 = vsel %vm390_vm5, %v474_v32, %v1007_v10  ;;  %v339_v52 = vmul.u32 %v332_v54, %v323_v38  ;;  %v507_v53 = vsub.s32 32, %v506_v40  ;;  %vm1071_vm6 = vcmp.le.f32.partialorder %v388_v13, 0.7853982 }
 0x11e   : > { %v467_v31 = vor.u32 4788187, %v466_v27  ;;  %v470_v48 = vcvt.s32.f32 %v463_v26  ;;  %v343_v55 = vsel %vm341_vm4, %v342_v42, %v1054_v35  ;;  %v499_v60 = vand.u32 8388607, %v492_v50 }
 0x11f   : > { %v344_v59 = vadd.s32 %v343_v55, %v339_v52  ;;  %v477_v61 = vsel %vm1071_vm6, 0, %v475_v30  ;;  %v664_v62 = vclz %v787_v51  ;;  %v510_v10 = vshrl.u32 %v862_v43, %v507_v53 }
 0x120   : > { %v468_v46 = vand.u32 2147483647, %v467_v31  ;;  %v513_v54 = vshrl.u32 %v863_v45, %v507_v53  ;;  %v1083_v0 = vshrl.u32 %v504_v33, 5  ;;  %v509_v1 = vshll.u32 %v861_v39, %v506_v40 }
 0x121   : > { %v345_v13 = vadd.s32 536870912, %v344_v59  ;;  %v512_v25 = vshll.u32 %v862_v43, %v506_v40  ;;  %v515_v3 = vshll.u32 %v863_v45, %v506_v40  ;;  %v516_v4 = vshrl.u32 %v864_v47, %v507_v53 }
 0x122   : > { %v471_v34 = vmul.f32 %v470_v48, %v468_v46  ;;  %v518_v14 = vshll.u32 %v864_v47, %v506_v40  ;;  %v519_v17 = vshrl.u32 %v865_v49, %v507_v53  ;;  %v511_v18 = vor.u32 %v510_v10, %v509_v1 }
 0x123   : > { %v1092_v37 = vshrl.u32 %v345_v13, 30  ;;  %v514_v20 = vor.u32 %v513_v54, %v512_v25  ;;  %v522_v5 = vshrl.u32 %v866_v56, %v507_v53  ;;  %v481_v19 = vadd.s32 3, %v477_v61 }
 0x124   : > { %v472_v58 = vxor.u32 2147483648, %v471_v34  ;;  %v520_v43 = vor.u32 %v519_v17, %v518_v14  ;;  %v788_v22 = vadd.s32 4294967294, %v664_v62  ;;  %v500_v45 = vor.u32 8388608, %v499_v60 }
 0x125   : > { %v347_v41 = vshll.u32 %v1092_v37, 30  ;;  %v517_v23 = vor.u32 %v516_v4, %v515_v3  ;;  %v521_v26 = vshll.u32 %v865_v49, %v506_v40  ;;  %vm524_vm7 = vcmp.lt.s32.totalorder %v1083_v0, 1 }
 0x126   : > { %v473_v63 = vsel %vm390_vm5, %v472_v58, %v471_v34  ;;  %vm527_vm8 = vcmp.lt.s32.totalorder %v1083_v0, 4  ;;  %v532_v28 = vsel %vm524_vm7, %v511_v18, %v514_v20  ;;  %v482_v11 = vand.u32 3, %v481_v19 }
 0x127   : > { %v476_v24 = vsel %vm1071_vm6, %v912_v8, %v473_v63  ;;  %v348_v27 = vsub.s32 %v344_v59, %v347_v41  ;;  %v523_v47 = vor.u32 %v522_v5, %v521_v26  ;;  %vm526_vm9 = vcmp.lt.s32.totalorder %v1083_v0, 3 }
 0x128   : > { %837 = vcosq.f32 %v476_v24  ;;  %v533_v35 = vsel %vm527_vm8, %v520_v43, 920167782  ;;  %vm789_vm10 = vcmp.lt.s32.totalorder %v788_v22, 0  ;;  %vm525_vm11 = vcmp.lt.s32.totalorder %v1083_v0, 2 }
 0x129   : > { %839 = vsinq.f32 %v476_v24  ;;  %v350_v56 = vsub.s32 0, %v348_v27  ;;  %v534_v49 = vsel %vm526_vm9, %v517_v23, %v533_v35  ;;  %v540_v31 = vshll.u32 %v500_v45, 8 }
 0x12a   : > { %v508_v33 = vshrl.u32 %v861_v39, %v507_v53  ;;  %v529_v38 = vsel %vm527_vm8, %v517_v23, 2102212464  ;;  %v535_v40 = vsel %vm525_vm11, %v532_v28, %v534_v49  ;;  %v536_v46 = vsel %vm524_vm7, %v514_v20, %v517_v23 }
 0x12b   : > { %v775_v32 = vmin.u32 %v350_v56, %v348_v27  ;;  %v537_v48 = vsel %vm527_vm8, %v523_v47, 1326507024  ;;  %v1112_v51 = vmul.u32.u64.low %v540_v31, %v535_v40  ;;  %v1113_v42 = vmul.u32.u64.high %v540_v31, %v535_v40, %v1112_v51 }
 0x12c   : > { %vm483_vm12 = vcmp.lt.s32.totalorder %v482_v11, 2  ;;  %vm484_vm13 = vcmp.eq.s32.totalorder %v482_v11, 0  ;;  %v667_v30 = vsel %vm789_vm10, 0, %v788_v22  ;;  %v528_v39 = vsel %vm524_vm7, %v508_v33, %v511_v18 }
 0x12d   : > { %v352_v52 = vclz %v775_v32  ;;  %v530_v53 = vsel %vm526_vm9, %v514_v20, %v529_v38  ;;  %v538_v58 = vsel %vm526_vm9, %v520_v43, %v537_v48  ;;  %vm487_vm14 = vcmp.eq.s32.totalorder %v482_v11, 2 }
 0x12e   : > { %v539_v61 = vsel %vm525_vm11, %v536_v46, %v538_v58  ;;  %v672_v10 = vsub.s32 4294967266, %v667_v30  ;;  %v531_v1 = vsel %vm525_vm11, %v528_v39, %v530_v53  ;;  %v550_v24 = vadd.s32 1, %v1113_v42 }
 0x12f   : > { %v776_v60 = vadd.s32 4294967294, %v352_v52  ;;  %v1124_v54 = vmul.u32.u64.low %v540_v31, %v539_v61  ;;  %v1125_v63 = vmul.u32.u64.high %v540_v31, %v539_v61, %v1124_v54  ;;  %vm480_vm0 = vweird.f32 %v912_v8 }
 0x130   : > { %v340_v14 = vadd.s32 %v1053_v21, %v1050_v29  ;;  %v673_v20 = vadd.s32 127, %v672_v10  ;;  %v547_v5 = vmul.u32 %v540_v31, %v531_v1  ;;  %v668_v22 = vsub.s32 32, %v667_v30 }
 0x131   : > { %vm777_vm15 = vcmp.lt.s32.totalorder %v776_v60, 0  ;;  %vm549_vm1 = vc.u32 %v1125_v63, %v1112_v51  ;;  %v652_v29 = vadd.s32 %v995_v2, %v1001_v6  ;;  %v669_v49 = vshll.u32 %v1042_v16, %v667_v30 }
 0x132   : > { %v838_v34 = vpop.eup %837  ;;  %v355_v3 = vsel %vm777_vm15, 0, %v776_v60  ;;  %v551_v8 = vsel %vm549_vm1, %v550_v24, %v1113_v42  ;;  %v674_v21 = vshll.u32 %v673_v20, 23  ;;  %v370_v33 = vsub.s32 4, %v1092_v37 }
 0x133   : > { %v840_v55 = vpop.eup %839  ;;  %v488_v57 = vxor.u32 2147483648, %v838_v34  ;;  %v356_v17 = vsub.s32 32, %v355_v3  ;;  %v360_v18 = vsub.s32 4294967266, %v355_v3  ;;  %v357_v0 = vshll.u32 %v348_v27, %v355_v3 }
 0x134   : > { %v485_v59 = vxor.u32 2147483648, %v840_v55  ;;  %v552_v43 = vadd.s32 %v551_v8, %v547_v5  ;;  %v670_v11 = vshrl.u32 %v652_v29, %v668_v22  ;;  %v675_v31 = vor.u32 4788187, %v674_v21 }
 0x135   : > { %v489_v62 = vsel %vm487_vm14, %v488_v57, %v840_v55  ;;  %v358_v19 = vshrl.u32 %v340_v14, %v356_v17  ;;  %v361_v41 = vadd.s32 127, %v360_v18  ;;  %vm286_vm2 = vcmp.lt.s32.totalorder %v920_v12, 0 }
 0x136   : > { %v486_v13 = vsel %vm484_vm13, %v838_v34, %v485_v59  ;;  %v553_v26 = vadd.s32 536870912, %v552_v43  ;;  %v671_v40 = vor.u32 %v670_v11, %v669_v49  ;;  %v676_v6 = vand.u32 2147483647, %v675_v31 }
 0x137   : > { %v490_v25 = vsel %vm483_vm12, %v486_v13, %v489_v62  ;;  %v359_v45 = vor.u32 %v358_v19, %v357_v0  ;;  %v362_v23 = vshll.u32 %v361_v41, 23  ;;  %vm285_vm3 = vcmp.le.f32.partialorder %v284_v36, 0.7853982 }
 0x138   : > { %v1133_v4 = vsel %vm480_vm0, nan, %v490_v25  ;;  %v1142_v28 = vshrl.u32 %v553_v26, 30  ;;  %v371_v42 = vsel %vm286_vm2, %v370_v33, %v1092_v37  ;;  %v678_v30 = vcvt.s32.f32 %v671_v40 }
 0x139   : > { %v363_v47 = vor.u32 4788187, %v362_v23  ;;  %v366_v35 = vcvt.s32.f32 %v359_v45  ;;  %v373_v52 = vsel %vm285_vm3, 0, %v371_v42  ;;  %v548_v36 = vadd.s32 %v1112_v51, %v1125_v63  ;;  %701 = vst [vmem:[%s1171_s25 + $0x8] sm:$0xff] %v1133_v4 }
 0x13a   : > { %v555_v27 = vshll.u32 %v1142_v28, 30  ;;  %v679_v57 = vmul.f32 %v678_v30, %v676_v6  ;;  %v377_v53 = vadd.s32 3, %v373_v52  ;;  %vm598_vm5 = vcmp.lt.s32.totalorder %v915_v9, 0 }
 0x13b   : > { %v364_v56 = vand.u32 2147483647, %v363_v47  ;;  %vm1159_vm6 = vcmp.le.f32.partialorder %v596_v15, 0.7853982  ;;  %vm376_vm9 = vweird.f32 %v920_v12  ;;  %v682_v5 = vsub.s32 4, %v1027_v44 }
 0x13c   : > { %v556_v38 = vsub.s32 %v552_v43, %v555_v27  ;;  %v680_v58 = vxor.u32 2147483648, %v679_v57  ;;  %v378_v37 = vand.u32 3, %v377_v53  ;;  %v578_v22 = vsub.s32 4, %v1142_v28 }
 0x13d   : > { %v367_v32 = vmul.f32 %v366_v35, %v364_v56  ;;  %vm494_vm11 = vcmp.lt.s32.totalorder %v1005_v7, 0  ;;  %vm493_vm12 = vcmp.le.f32.partialorder %v492_v50, 0.7853982 }
 0x13e   : > { %v558_v2 = vsub.s32 0, %v556_v38  ;;  %v681_v1 = vsel %vm598_vm5, %v680_v58, %v679_v57  ;;  %vm383_vm7 = vcmp.eq.s32.totalorder %v378_v37, 2  ;;  %vm380_vm8 = vcmp.eq.s32.totalorder %v378_v37, 0 }
 0x13f   : > { %v368_v46 = vxor.u32 2147483648, %v367_v32  ;;  %v684_v17 = vsel %vm1159_vm6, %v915_v9, %v681_v1  ;;  %vm379_vm10 = vcmp.lt.s32.totalorder %v378_v37, 2  ;;  %v579_v26 = vsel %vm494_vm11, %v578_v22, %v1142_v28 }
 0x140   : > { %v783_v16 = vmin.u32 %v558_v2, %v556_v38  ;;  %v581_v4 = vsel %vm493_vm12, 0, %v579_v26 }
 0x141   : > { %v369_v48 = vsel %vm286_vm2, %v368_v46, %v367_v32  ;;  %v585_v56 = vadd.s32 3, %v581_v4 }
 0x142   : > { %v372_v34 = vsel %vm285_vm3, %v920_v12, %v369_v48  ;;  %v560_v55 = vclz %v783_v16  ;;  %v683_v12 = vsel %vm598_vm5, %v682_v5, %v1027_v44  ;;  %vm584_vm3 = vweird.f32 %v1005_v7 }
 0x143   : > { %841 = vcosq.f32 %v372_v34  ;;  %v685_v29 = vsel %vm1159_vm6, 0, %v683_v12  ;;  %v586_v31 = vand.u32 3, %v585_v56 }
 0x144   : > { %843 = vsinq.f32 %v372_v34  ;;  %v784_v39 = vadd.s32 4294967294, %v560_v55  ;;  %v689_v47 = vadd.s32 3, %v685_v29 }
 0x145   : > { %845 = vcosq.f32 %v684_v17  ;;  %vm591_vm15 = vcmp.eq.s32.totalorder %v586_v31, 2  ;;  %vm588_vm1 = vcmp.eq.s32.totalorder %v586_v31, 0  ;;  %vm587_vm2 = vcmp.lt.s32.totalorder %v586_v31, 2 }
 0x146   : > { %vm785_vm4 = vcmp.lt.s32.totalorder %v784_v39, 0  ;;  %847 = vsinq.f32 %v684_v17  ;;  %v690_v35 = vand.u32 3, %v689_v47 }
 0x147   : > { %v563_v59 = vsel %vm785_vm4, 0, %v784_v39  ;;  %vm688_vm4 = vweird.f32 %v915_v9 }
 0x148   : > { %v564_v60 = vsub.s32 32, %v563_v59  ;;  %v568_v61 = vsub.s32 4294967266, %v563_v59  ;;  %v565_v62 = vshll.u32 %v556_v38, %v563_v59  ;;  %vm692_vm13 = vcmp.eq.s32.totalorder %v690_v35, 0 }
 0x149   : > { %vm695_vm14 = vcmp.eq.s32.totalorder %v690_v35, 2  ;;  %vm691_vm0 = vcmp.lt.s32.totalorder %v690_v35, 2 }
 0x14a   : > { %v566_v10 = vshrl.u32 %v548_v36, %v564_v60  ;;  %v569_v54 = vadd.s32 127, %v568_v61 }
 0x14c   : > { %v567_v3 = vor.u32 %v566_v10, %v565_v62  ;;  %v570_v14 = vshll.u32 %v569_v54, 23 }
 0x14d   : > { %v842_v13 = vpop.eup %841 }
 0x14e   : > { %v844_v24 = vpop.eup %843  ;;  %v384_v25 = vxor.u32 2147483648, %v842_v13  ;;  %v571_v20 = vor.u32 4788187, %v570_v14  ;;  %v574_v41 = vcvt.s32.f32 %v567_v3 }
 0x14f   : > { %v381_v63 = vxor.u32 2147483648, %v844_v24  ;;  %v846_v11 = vpop.eup %845 }
 0x150   : > { %v385_v18 = vsel %vm383_vm7, %v384_v25, %v844_v24  ;;  %v572_v19 = vand.u32 2147483647, %v571_v20  ;;  %v848_v44 = vpop.eup %847  ;;  %v696_v49 = vxor.u32 2147483648, %v846_v11 }
 0x151   : > { %v382_v15 = vsel %vm380_vm8, %v842_v13, %v381_v63  ;;  %v693_v27 = vxor.u32 2147483648, %v848_v44 }
 0x152   : > { %v386_v0 = vsel %vm379_vm10, %v382_v15, %v385_v18  ;;  %v575_v43 = vmul.f32 %v574_v41, %v572_v19  ;;  %v697_v33 = vsel %vm695_vm14, %v696_v49, %v848_v44 }
 0x153   : > { %v387_v8 = vsel %vm376_vm9, nan, %v386_v0  ;;  %v694_v32 = vsel %vm692_vm13, %v846_v11, %v693_v27 }
 0x154   : > { %700 = vst [vmem:[%s1171_s25] sm:$0xff] %v387_v8  ;;  %v576_v45 = vxor.u32 2147483648, %v575_v43  ;;  %v698_v2 = vsel %vm691_vm0, %v694_v32, %v697_v33 }
 0x155   : > { %v699_v34 = vsel %vm688_vm4, nan, %v698_v2 }
 0x156   : > { %v577_v23 = vsel %vm494_vm11, %v576_v45, %v575_v43  ;;  %703 = vst [vmem:[%s1171_s25 + $0x18] sm:$0xff] %v699_v34 }
 0x157   : > { %v580_v21 = vsel %vm493_vm12, %v1005_v7, %v577_v23 }
 0x158   : > { %849 = vcosq.f32 %v580_v21 }
 0x159   : > { %851 = vsinq.f32 %v580_v21 }
 0x162   : > { %v850_v50 = vpop.eup %849 }
 0x163   : > { %v852_v28 = vpop.eup %851  ;;  %v592_v38 = vxor.u32 2147483648, %v850_v50 }
 0x164   : > { %v589_v40 = vxor.u32 2147483648, %v852_v28 }
 0x165   : > { %v593_v46 = vsel %vm591_vm15, %v592_v38, %v852_v28 }
 0x166   : > { %v590_v6 = vsel %vm588_vm1, %v850_v50, %v589_v40 }
 0x167   : > { %v594_v48 = vsel %vm587_vm2, %v590_v6, %v593_v46 }
 0x168   : > { %v595_v42 = vsel %vm584_vm3, nan, %v594_v48 }
 0x169   : > { %702 = vst [vmem:[%s1171_s25 + $0x10] sm:$0xff] %v595_v42 }
 0x16a PF: > { %s13_s12 = sadd.s32 1, %s859_s12  }
 0x16b   : > { %p10_p4 = scmp.ge.s32.totalorder %s13_s12, 4  }
 0x16d   :  { %12 = sbr.rel (!%p10_p4) target bundleno = 1 (0x1), region = 62 }

</bundles_post_ra>
